<compile_context>
chip_gen: v6e
topology: v6e:2x2x1
jax: 0.10.0
libtpu: 0.0.40
codegen_flags: <defaults>
</compile_context>

<pallas_src>
import functools

import jax
import jax.numpy as jnp
from jax.experimental import pallas as pl
from jax.experimental.pallas import tpu as pltpu


def _round_up(x, m):
    return ((x + m - 1) // m) * m


def _softmax_loss_kernel(x_ref, w_ref, b_ref, lab_ref, loss_ref,
                         m_ref, l_ref, t_ref, *, tile_n, tile_s, n_rows, inv_n):
    # x_ref:   (tile_n, D)      bfloat16
    # w_ref:   (D, tile_s)      bfloat16   (transposed nn.Linear weight slice)
    # b_ref:   (1, tile_s)      float32    (padded columns hold -1e30)
    # lab_ref: (tile_n, 1)      int32
    # loss_ref:(1, 1)           float32    (resident accumulator / final loss)
    # m/l/t:   (tile_n, 1)      float32    online-softmax running stats scratch
    i = pl.program_id(0)
    j = pl.program_id(1)
    n_i = pl.num_programs(0)
    n_j = pl.num_programs(1)

    @pl.when(jnp.logical_and(i == 0, j == 0))
    def _():
        loss_ref[...] = jnp.zeros_like(loss_ref)

    @pl.when(j == 0)
    def _():
        m_ref[...] = jnp.full_like(m_ref, -jnp.inf)
        l_ref[...] = jnp.zeros_like(l_ref)
        t_ref[...] = jnp.zeros_like(t_ref)

    # MXU matmul: bf16 x bf16 -> f32 accumulate, then f32 bias add.
    logits = jnp.dot(x_ref[...], w_ref[...], preferred_element_type=jnp.float32)
    logits = logits + b_ref[...]                                   # (tile_n, tile_s)

    # Online logsumexp update (all (tile_n, 1) keepdims, f32).
    m_prev = m_ref[...]
    m_new = jnp.maximum(m_prev, jnp.max(logits, axis=-1, keepdims=True))
    alpha = jnp.exp(m_prev - m_new)
    l_ref[...] = alpha * l_ref[...] + jnp.sum(jnp.exp(logits - m_new),
                                              axis=-1, keepdims=True)
    m_ref[...] = m_new

    # True-class logit for labels falling inside this S tile (select, no f32 one-hot).
    lane = jax.lax.broadcasted_iota(jnp.int32, logits.shape, 1) + j * tile_s
    t_ref[...] += jnp.sum(jnp.where(lane == lab_ref[...], logits, 0.0),
                          axis=-1, keepdims=True)

    # Finalize this N-tile once the last S tile has been folded in.
    @pl.when(j == n_j - 1)
    def _():
        lse = m_ref[...] + jnp.log(l_ref[...])                     # (tile_n, 1)
        per_row = lse - t_ref[...]                                 # (tile_n, 1)
        row = jax.lax.broadcasted_iota(jnp.int32, per_row.shape, 0) + i * tile_n
        per_row = jnp.where(row < n_rows, per_row, 0.0)            # mask padded rows
        loss_ref[...] += jnp.sum(per_row, axis=0, keepdims=True)

    @pl.when(jnp.logical_and(i == n_i - 1, j == n_j - 1))
    def _():
        loss_ref[...] = loss_ref[...] * inv_n


def softmax_loss(x, label, weight, bias, *, tile_n=256, tile_s=512):
    """x: (..., D), label: (...,) int, weight: (S, D), bias: (S,) -> scalar loss."""
    D = x.shape[-1]
    S = weight.shape[0]
    x2d = x.reshape(-1, D)
    lab = label.reshape(-1).astype(jnp.int32)
    N = x2d.shape[0]

    tile_n = min(tile_n, _round_up(N, 8))
    tile_s = min(tile_s, _round_up(S, 128))
    n_pad = _round_up(N, tile_n)
    s_pad = _round_up(S, tile_s)

    # bf16 inputs for the MXU / halved HBM bytes; softmax math stays f32 in-kernel.
    # Zero-padded x rows / W columns are harmless; padded bias columns get -1e30 so
    # they vanish from the softmax denominator; padded rows are masked in-kernel.
    x_p = jnp.zeros((n_pad, D), jnp.bfloat16).at[:N].set(x2d.astype(jnp.bfloat16))
    # TODO(synk): carry fc weight pre-transposed as (D, S) in the training state to
    # avoid this per-call transpose round-trip through HBM.
    w_p = jnp.zeros((D, s_pad), jnp.bfloat16).at[:, :S].set(
        jnp.transpose(weight).astype(jnp.bfloat16))
    b_p = jnp.full((1, s_pad), -1e30, jnp.float32).at[0, :S].set(
        bias.astype(jnp.float32))
    lab_p = jnp.zeros((n_pad, 1), jnp.int32).at[:N, 0].set(lab)

    num_i = n_pad // tile_n
    num_j = s_pad // tile_s

    kernel = functools.partial(_softmax_loss_kernel, tile_n=tile_n, tile_s=tile_s,
                               n_rows=N, inv_n=1.0 / N)

    # TODO(synk): for v7x megacore, emit per-N-tile partial sums on a "parallel" N axis
    # and reduce in the wrapper instead of the serial resident accumulator.
    loss = pl.pallas_call(
        kernel,
        out_shape=jax.ShapeDtypeStruct((1, 1), jnp.float32),
        grid_spec=pltpu.PrefetchScalarGridSpec(
            num_scalar_prefetch=0,
            grid=(num_i, num_j),                       # S (reduction) axis last
            in_specs=[
                pl.BlockSpec((tile_n, D), lambda i, j: (i, 0)),     # x tile
                pl.BlockSpec((D, tile_s), lambda i, j: (0, j)),     # W^T column tile
                pl.BlockSpec((1, tile_s), lambda i, j: (0, j)),     # bias column tile
                pl.BlockSpec((tile_n, 1), lambda i, j: (i, 0)),     # labels tile
            ],
            out_specs=pl.BlockSpec((1, 1), lambda i, j: (0, 0)),    # resident scalar
            scratch_shapes=[pltpu.VMEM((tile_n, 1), jnp.float32)] * 3,
        ),
        compiler_params=pltpu.CompilerParams(
            dimension_semantics=("arbitrary", "arbitrary"),
        ),
    )(x_p, w_p, b_p, lab_p)
    return loss[0, 0]


if __name__ == "__main__":
    embedding_dim = 32
    n_speakers = 128
    B, T = 2, 8          # x: (B, T, embedding_dim) -> N = 16 rows after reshape

    key = jax.random.PRNGKey(0)
    kx, kw, kb, kl = jax.random.split(key, 4)

    x = jax.random.normal(kx, (B, T, embedding_dim), dtype=jnp.float32)
    label = jax.random.randint(kl, (B, T), 0, n_speakers, dtype=jnp.int32)

    # Deterministic nn.Linear-style init (uniform in +-1/sqrt(fan_in)).
    bound = 1.0 / (embedding_dim ** 0.5)
    fc_weight = jax.random.uniform(kw, (n_speakers, embedding_dim),
                                   minval=-bound, maxval=bound, dtype=jnp.float32)
    fc_bias = jax.random.uniform(kb, (n_speakers,),
                                 minval=-bound, maxval=bound, dtype=jnp.float32)

    loss = softmax_loss(x, label, fc_weight, fc_bias)
    jax.block_until_ready(loss)

    # Pure-JAX reference using the same bf16 input quantization the kernel feeds the MXU.
    x2d = x.reshape(-1, embedding_dim).astype(jnp.bfloat16).astype(jnp.float32)
    w_bf = fc_weight.astype(jnp.bfloat16).astype(jnp.float32)
    logits_ref = x2d @ w_bf.T + fc_bias
    lab_flat = label.reshape(-1)
    lse = jax.nn.logsumexp(logits_ref, axis=-1)
    ref = jnp.mean(lse - logits_ref[jnp.arange(lab_flat.shape[0]), lab_flat])
    assert jnp.allclose(loss, ref, atol=1e-4, rtol=1e-4), (loss, ref)

    print("KERNEL_OK")
</pallas_src>

<mosaic_0001>
module attributes {stable_mosaic.version = 11 : i64} {
  func.func @_softmax_loss_kernel(%arg0: i32, %arg1: i32, %arg2: memref<16x32xbf16, #tpu.memory_space<vmem>>, %arg3: memref<32x128xbf16, #tpu.memory_space<vmem>>, %arg4: memref<1x128xf32, #tpu.memory_space<vmem>>, %arg5: memref<16x1xi32, #tpu.memory_space<vmem>>, %arg6: memref<1x1xf32, #tpu.memory_space<vmem>>, %arg7: memref<16x1xf32, #tpu.memory_space<vmem>>, %arg8: memref<16x1xf32, #tpu.memory_space<vmem>>, %arg9: memref<16x1xf32, #tpu.memory_space<vmem>>) attributes {dimension_semantics = [#tpu.dimension_semantics<arbitrary>, #tpu.dimension_semantics<arbitrary>], iteration_bounds = array<i64: 1, 1>, scalar_prefetch = 0 : i64, scratch_operands = 3 : i64, tpu.core_type = #tpu.core_type<tc>, window_params = [{transform_indices = @transform_0, window_bounds = array<i64: 16, 32>}, {transform_indices = @transform_1, window_bounds = array<i64: 32, 128>}, {transform_indices = @transform_2, window_bounds = array<i64: 1, 128>}, {transform_indices = @transform_3, window_bounds = array<i64: 16, 1>}, {pipeline_mode = #tpu.pipeline_mode<synchronous>, transform_indices = @transform_4, window_bounds = array<i64: 1, 1>}]} {
    %c0_i32 = arith.constant 0 : i32
    %0 = arith.cmpi eq, %arg0, %c0_i32 : i32
    %c0_i32_0 = arith.constant 0 : i32
    %1 = arith.cmpi eq, %arg1, %c0_i32_0 : i32
    %2 = arith.andi %0, %1 : i1
    %3 = arith.extui %2 : i1 to i32
    %c0_i32_1 = arith.constant 0 : i32
    %4 = arith.cmpi ne, %3, %c0_i32_1 : i32
    scf.if %4 {
      %cst_32 = arith.constant 0.000000e+00 : f32
      %52 = vector.broadcast %cst_32 : f32 to vector<1x1xf32>
      %c0_33 = arith.constant 0 : index
      %c0_34 = arith.constant 0 : index
      %53 = vector.load %arg6[%c0_33, %c0_34] : memref<1x1xf32, #tpu.memory_space<vmem>>, vector<1x1xf32>
      tpu.vector_store %arg6[%c0_33, %c0_34], %52 {strides = array<i32>} : memref<1x1xf32, #tpu.memory_space<vmem>>, vector<1x1xf32>,
    } else {
    }
    %c0_i32_2 = arith.constant 0 : i32
    %5 = arith.cmpi eq, %arg1, %c0_i32_2 : i32
    %6 = arith.extui %5 : i1 to i32
    %c0_i32_3 = arith.constant 0 : i32
    %7 = arith.cmpi ne, %6, %c0_i32_3 : i32
    scf.if %7 {
      %cst_32 = arith.constant 0xFF800000 : f32
      %52 = vector.broadcast %cst_32 : f32 to vector<16x1xf32>
      %c0_33 = arith.constant 0 : index
      %c0_34 = arith.constant 0 : index
      %53 = vector.load %arg7[%c0_33, %c0_34] : memref<16x1xf32, #tpu.memory_space<vmem>>, vector<16x1xf32>
      tpu.vector_store %arg7[%c0_33, %c0_34], %52 {strides = array<i32>} : memref<16x1xf32, #tpu.memory_space<vmem>>, vector<16x1xf32>,
      %cst_35 = arith.constant 0.000000e+00 : f32
      %54 = vector.broadcast %cst_35 : f32 to vector<16x1xf32>
      %c0_36 = arith.constant 0 : index
      %c0_37 = arith.constant 0 : index
      %55 = vector.load %arg8[%c0_36, %c0_37] : memref<16x1xf32, #tpu.memory_space<vmem>>, vector<16x1xf32>
      tpu.vector_store %arg8[%c0_36, %c0_37], %54 {strides = array<i32>} : memref<16x1xf32, #tpu.memory_space<vmem>>, vector<16x1xf32>,
      %cst_38 = arith.constant 0.000000e+00 : f32
      %56 = vector.broadcast %cst_38 : f32 to vector<16x1xf32>
      %c0_39 = arith.constant 0 : index
      %c0_40 = arith.constant 0 : index
      %57 = vector.load %arg9[%c0_39, %c0_40] : memref<16x1xf32, #tpu.memory_space<vmem>>, vector<16x1xf32>
      tpu.vector_store %arg9[%c0_39, %c0_40], %56 {strides = array<i32>} : memref<16x1xf32, #tpu.memory_space<vmem>>, vector<16x1xf32>,
    } else {
    }
    %c0 = arith.constant 0 : index
    %c0_4 = arith.constant 0 : index
    %8 = vector.load %arg2[%c0, %c0_4] : memref<16x32xbf16, #tpu.memory_space<vmem>>, vector<16x32xbf16>
    %c0_5 = arith.constant 0 : index
    %c0_6 = arith.constant 0 : index
    %9 = vector.load %arg3[%c0_5, %c0_6] : memref<32x128xbf16, #tpu.memory_space<vmem>>, vector<32x128xbf16>
    %cst = arith.constant dense<0.000000e+00> : vector<16x128xf32>
    %10 = tpu.matmul %8, %9, %cst {dimension_numbers = #tpu.dot_dimension_numbers<[1], [0], [0], [1], [0, 0, 1, 1], [], []>} : vector<16x32xbf16>, vector<32x128xbf16>, vector<16x128xf32> -> vector<16x128xf32>
    %c0_7 = arith.constant 0 : index
    %c0_8 = arith.constant 0 : index
    %11 = vector.load %arg4[%c0_7, %c0_8] : memref<1x128xf32, #tpu.memory_space<vmem>>, vector<1x128xf32>
    %12 = vector.broadcast %11 : vector<1x128xf32> to vector<16x128xf32>
    %13 = arith.addf %10, %12 : vector<16x128xf32>
    %c0_9 = arith.constant 0 : index
    %c0_10 = arith.constant 0 : index
    %14 = vector.load %arg7[%c0_9, %c0_10] : memref<16x1xf32, #tpu.memory_space<vmem>>, vector<16x1xf32>
    %cst_11 = arith.constant dense<0xFF800000> : vector<16xf32>
    %15 = vector.multi_reduction <maximumf>, %13, %cst_11 [1] : vector<16x128xf32> to vector<16xf32>
    %16 = vector.shape_cast %15 : vector<16xf32> to vector<16x1xf32>
    %17 = arith.maximumf %14, %16 : vector<16x1xf32>
    %18 = arith.subf %14, %17 : vector<16x1xf32>
    %19 = math.exp %18 : vector<16x1xf32>
    %c0_12 = arith.constant 0 : index
    %c0_13 = arith.constant 0 : index
    %20 = vector.load %arg8[%c0_12, %c0_13] : memref<16x1xf32, #tpu.memory_space<vmem>>, vector<16x1xf32>
    %21 = arith.mulf %19, %20 : vector<16x1xf32>
    %22 = vector.broadcast %17 : vector<16x1xf32> to vector<16x128xf32>
    %23 = arith.subf %13, %22 : vector<16x128xf32>
    %24 = math.exp %23 : vector<16x128xf32>
    %cst_14 = arith.constant dense<0.000000e+00> : vector<16xf32>
    %25 = vector.multi_reduction <add>, %24, %cst_14 [1] : vector<16x128xf32> to vector<16xf32>
    %26 = vector.shape_cast %25 : vector<16xf32> to vector<16x1xf32>
    %27 = arith.addf %21, %26 : vector<16x1xf32>
    %c0_15 = arith.constant 0 : index
    %c0_16 = arith.constant 0 : index
    %28 = vector.load %arg8[%c0_15, %c0_16] : memref<16x1xf32, #tpu.memory_space<vmem>>, vector<16x1xf32>
    tpu.vector_store %arg8[%c0_15, %c0_16], %27 {strides = array<i32>} : memref<16x1xf32, #tpu.memory_space<vmem>>, vector<16x1xf32>,
    %c0_17 = arith.constant 0 : index
    %c0_18 = arith.constant 0 : index
    %29 = vector.load %arg7[%c0_17, %c0_18] : memref<16x1xf32, #tpu.memory_space<vmem>>, vector<16x1xf32>
    tpu.vector_store %arg7[%c0_17, %c0_18], %17 {strides = array<i32>} : memref<16x1xf32, #tpu.memory_space<vmem>>, vector<16x1xf32>,
    %30 = tpu.iota {dimensions = array<i32: 1>} : vector<16x128xi32>
    %c128_i32 = arith.constant 128 : i32
    %31 = arith.muli %arg1, %c128_i32 : i32
    %32 = vector.broadcast %31 : i32 to vector<16x128xi32>
    %33 = arith.addi %30, %32 : vector<16x128xi32>
    %c0_19 = arith.constant 0 : index
    %c0_20 = arith.constant 0 : index
    %34 = vector.load %arg9[%c0_19, %c0_20] : memref<16x1xf32, #tpu.memory_space<vmem>>, vector<16x1xf32>
    %c0_21 = arith.constant 0 : index
    %c0_22 = arith.constant 0 : index
    %35 = vector.load %arg5[%c0_21, %c0_22] : memref<16x1xi32, #tpu.memory_space<vmem>>, vector<16x1xi32>
    %36 = vector.broadcast %35 : vector<16x1xi32> to vector<16x128xi32>
    %37 = arith.cmpi eq, %33, %36 : vector<16x128xi32>
    %cst_23 = arith.constant 0.000000e+00 : f32
    %38 = vector.broadcast %cst_23 : f32 to vector<16x128xf32>
    %39 = arith.select %37, %13, %38 : vector<16x128xi1>, vector<16x128xf32>
    %cst_24 = arith.constant dense<0.000000e+00> : vector<16xf32>
    %40 = vector.multi_reduction <add>, %39, %cst_24 [1] : vector<16x128xf32> to vector<16xf32>
    %41 = vector.shape_cast %40 : vector<16xf32> to vector<16x1xf32>
    %42 = arith.addf %34, %41 : vector<16x1xf32>
    %c0_25 = arith.constant 0 : index
    %c0_26 = arith.constant 0 : index
    %43 = vector.load %arg9[%c0_25, %c0_26] : memref<16x1xf32, #tpu.memory_space<vmem>>, vector<16x1xf32>
    tpu.vector_store %arg9[%c0_25, %c0_26], %42 {strides = array<i32>} : memref<16x1xf32, #tpu.memory_space<vmem>>, vector<16x1xf32>,
    %c0_i32_27 = arith.constant 0 : i32
    %44 = arith.cmpi eq, %arg1, %c0_i32_27 : i32
    %45 = arith.extui %44 : i1 to i32
    %c0_i32_28 = arith.constant 0 : i32
    %46 = arith.cmpi ne, %45, %c0_i32_28 : i32
    scf.if %46 {
      %c0_32 = arith.constant 0 : index
      %c0_33 = arith.constant 0 : index
      %52 = vector.load %arg7[%c0_32, %c0_33] : memref<16x1xf32, #tpu.memory_space<vmem>>, vector<16x1xf32>
      %c0_34 = arith.constant 0 : index
      %c0_35 = arith.constant 0 : index
      %53 = vector.load %arg8[%c0_34, %c0_35] : memref<16x1xf32, #tpu.memory_space<vmem>>, vector<16x1xf32>
      %54 = math.log %53 : vector<16x1xf32>
      %55 = arith.addf %52, %54 : vector<16x1xf32>
      %c0_36 = arith.constant 0 : index
      %c0_37 = arith.constant 0 : index
      %56 = vector.load %arg9[%c0_36, %c0_37] : memref<16x1xf32, #tpu.memory_space<vmem>>, vector<16x1xf32>
      %57 = arith.subf %55, %56 : vector<16x1xf32>
      %58 = tpu.iota {dimensions = array<i32: 0>} : vector<16x1xi32>
      %c16_i32 = arith.constant 16 : i32
      %59 = arith.muli %arg0, %c16_i32 : i32
      %60 = vector.broadcast %59 : i32 to vector<16x1xi32>
      %61 = arith.addi %58, %60 : vector<16x1xi32>
      %c16_i32_38 = arith.constant 16 : i32
      %62 = vector.broadcast %c16_i32_38 : i32 to vector<16x1xi32>
      %63 = arith.cmpi slt, %61, %62 : vector<16x1xi32>
      %cst_39 = arith.constant 0.000000e+00 : f32
      %64 = vector.broadcast %cst_39 : f32 to vector<16x1xf32>
      %65 = arith.select %63, %57, %64 : vector<16x1xi1>, vector<16x1xf32>
      %c0_40 = arith.constant 0 : index
      %c0_41 = arith.constant 0 : index
      %66 = vector.load %arg6[%c0_40, %c0_41] : memref<1x1xf32, #tpu.memory_space<vmem>>, vector<1x1xf32>
      %cst_42 = arith.constant dense<0.000000e+00> : vector<1xf32>
      %67 = vector.multi_reduction <add>, %65, %cst_42 [0] : vector<16x1xf32> to vector<1xf32>
      %68 = vector.shape_cast %67 : vector<1xf32> to vector<1x1xf32>
      %69 = arith.addf %66, %68 : vector<1x1xf32>
      %c0_43 = arith.constant 0 : index
      %c0_44 = arith.constant 0 : index
      %70 = vector.load %arg6[%c0_43, %c0_44] : memref<1x1xf32, #tpu.memory_space<vmem>>, vector<1x1xf32>
      tpu.vector_store %arg6[%c0_43, %c0_44], %69 {strides = array<i32>} : memref<1x1xf32, #tpu.memory_space<vmem>>, vector<1x1xf32>,
    } else {
    }
    %c0_i32_29 = arith.constant 0 : i32
    %47 = arith.cmpi eq, %arg0, %c0_i32_29 : i32
    %c0_i32_30 = arith.constant 0 : i32
    %48 = arith.cmpi eq, %arg1, %c0_i32_30 : i32
    %49 = arith.andi %47, %48 : i1
    %50 = arith.extui %49 : i1 to i32
    %c0_i32_31 = arith.constant 0 : i32
    %51 = arith.cmpi ne, %50, %c0_i32_31 : i32
    scf.if %51 {
      %c0_32 = arith.constant 0 : index
      %c0_33 = arith.constant 0 : index
      %52 = vector.load %arg6[%c0_32, %c0_33] : memref<1x1xf32, #tpu.memory_space<vmem>>, vector<1x1xf32>
      %cst_34 = arith.constant 6.250000e-02 : f32
      %53 = vector.broadcast %cst_34 : f32 to vector<1x1xf32>
      %54 = arith.mulf %52, %53 : vector<1x1xf32>
      %c0_35 = arith.constant 0 : index
      %c0_36 = arith.constant 0 : index
      %55 = vector.load %arg6[%c0_35, %c0_36] : memref<1x1xf32, #tpu.memory_space<vmem>>, vector<1x1xf32>
      tpu.vector_store %arg6[%c0_35, %c0_36], %54 {strides = array<i32>} : memref<1x1xf32, #tpu.memory_space<vmem>>, vector<1x1xf32>,
    } else {
    }
    return
  }
  func.func @transform_0(%arg0: i32, %arg1: i32) -> (i32, i32) {
    %c0_i32 = arith.constant 0 : i32
    %c0_i32_0 = arith.constant 0 : i32
    return %arg0, %c0_i32 : i32, i32
  }
  func.func @transform_1(%arg0: i32, %arg1: i32) -> (i32, i32) {
    %c0_i32 = arith.constant 0 : i32
    %c0_i32_0 = arith.constant 0 : i32
    return %c0_i32, %arg1 : i32, i32
  }
  func.func @transform_2(%arg0: i32, %arg1: i32) -> (i32, i32) {
    %c0_i32 = arith.constant 0 : i32
    %c0_i32_0 = arith.constant 0 : i32
    return %c0_i32, %arg1 : i32, i32
  }
  func.func @transform_3(%arg0: i32, %arg1: i32) -> (i32, i32) {
    %c0_i32 = arith.constant 0 : i32
    %c0_i32_0 = arith.constant 0 : i32
    return %arg0, %c0_i32 : i32, i32
  }
  func.func @transform_4(%arg0: i32, %arg1: i32) -> (i32, i32) {
    %c0_i32 = arith.constant 0 : i32
    %c0_i32_0 = arith.constant 0 : i32
    %c0_i32_1 = arith.constant 0 : i32
    return %c0_i32, %c0_i32_0 : i32, i32
  }
}

</mosaic_0001>

<bundles_post_ra>
// kernel: tpu_custom_call.1
= control target key start
LH: loop header
LB: loop body
LE: loop exit
PB: predicated region body
PF: predicated region fallthrough
CT: control target
= control target key end

     0   :  { %9 = vsyncpa [#allocation6], 0  ;;  %s424_s0 = inlined_call_operand.hbm [shape: bf16[16,32], index: 0, kind: input, shape index: {}]   ;;  %s425_s1 = inlined_call_operand.vmem [shape: bf16[32,128], index: 1, kind: input, shape index: {}]   ;;  %s426_s2 = inlined_call_operand.vmem [shape: f32[1,128], index: 2, kind: input, shape index: {}]   ;;  %s427_s3 = inlined_call_operand.vmem [shape: s32[16,1], index: 3, kind: input, shape index: {}]   ;;  %s428_s4 = inlined_call_operand.hbm [shape: f32[1,1], index: 4, kind: output, shape index: {}]  }
   0x1   :  { %10 = vsyncpa [#allocation7], 0  ;;  %s345_s15 = smov [#allocation5]  }
   0x2   :  { %s16_s16 = sshll.u32 %s345_s15, 4  ;;  %s17_s16 = int_to_ptr.vmem [resolvable:$true] %s16_s16 }
   0x3   :  { %s309_s17 = scalar_lea.vmem %s17_s16, 128  ;;  %p314_p1 = scmp.lt.s32.totalorder %s17_s16, %s17_s16 }
   0x4   :  { %p310_p0 = scmp.ne.s32.totalorder %s17_s16, %s309_s17  ;;  %p315_p2 = scmp.lt.s32.totalorder %s309_s17, %s309_s17 }
   0x6   :  { %p316_p3 = por %p315_p2, %p314_p1 }
   0x8   :  { %p317_p4 = pnand %p316_p3, %p310_p0 }
   0xa   :  { %320 = shalt.err (!%p317_p4)
}
   0xb   :  { %s346_s18 = smov 64   ;;  %s347_s19 = smov 4  }
   0xc   :  { %22 = dma.hbm_to_vmem [thread:$0]  %s424_s0, 128, %s17_s16, [#allocation6], %s346_s18, %s346_s18, %s347_s19  }
   0xd   :  { %341 = dma.done.wait [#allocation6], 128  }
   0xe   :  { %342 = vsyncadd [#allocation6], 4294967168  ;;  %v348_v0 = vmov 0.0   ;;  %vm349_vm0 = vmmov 0   ;;  %v286_v1 = vld [vmem:[%s425_s1 + $0x8] sm:$0xff]   ;;  %v287_v2 = vld [vmem:[%s425_s1] sm:$0xff]   ;;  %v171_v21 = vlaneseq }
   0xf   :  { %268 = vmatprep.subr.bf16.mxu0 %v348_v0  ;;  %272 = vmatprep.mubr.msk.bf16.mxu0 %vm349_vm0, %v348_v0  ;;  %v288_v3 = vld [vmem:[#allocation5] sm:$0xff]   ;;  %vm81_vm1 = vcmask 261120   ;;  %v350_v4 = vmov 0   ;;  %vm44_vm2 = vcmask 7168   ;;  %v351_v5 = vmov -inf   ;;  %v178_v13 = vld [vmem:[%s427_s3] sm:$0xff] }
  0x10   :  { %269 = vmatpush3.bf16.msra.mxu0 %v286_v1  ;;  %285 = vset.pattern.permute.xlu0 %v350_v4  ;;  %45 = vst.msk [vmem:[#allocation2] sm:$0xff] %vm44_vm2, %v351_v5  ;;  %46 = vst.msk [vmem:[#allocation2 + $0x8] sm:$0xff] %vm44_vm2, %v351_v5  ;;  %v260_v6 = vld [vmem:[%s426_s2] ss:$0 sm:$0xff]  ;;  %v179_v23 = vld [vmem:[%s427_s3 + $0x8] sm:$0xff]  ;;  %v172_v24 = vand.u32 127, %v171_v21 }
  0x11   :  { %270 = vmatprep.subr.bf16.mxu0 %v348_v0  ;;  %284 = vset.pattern.permute.xlu1 %v350_v4  ;;  %47 = vst.msk [vmem:[#allocation3] sm:$0xff] %vm44_vm2, %v348_v0  ;;  %48 = vst.msk [vmem:[#allocation3 + $0x8] sm:$0xff] %vm44_vm2, %v348_v0  ;;  %vm39_vm5 = vcmask 0   ;;  %s352_s3 = smov [#allocation8]  }
  0x12   :  { %49 = vst.msk [vmem:[#allocation4] sm:$0xff] %vm44_vm2, %v348_v0  ;;  %50 = vst.msk [vmem:[#allocation4 + $0x8] sm:$0xff] %vm44_vm2, %v348_v0  ;;  %s251_s29 = sshll.u32 %s352_s3, 4  ;;  %s252_s29 = int_to_ptr.vmem [resolvable:$true] %s251_s29 }
  0x13   :  { %40 = vst.msk [vmem:[#allocation8] sm:$0x1] %vm39_vm5, %v348_v0  ;;  %s321_s30 = scalar_lea.vmem %s252_s29, 16  ;;  %s325_s5 = scalar_lea.vmem %s252_s29, 32 }
  0x14   :  { %271 = vmatpush3.bf16.msra.mxu0 %v287_v2  ;;  %p322_p5 = scmp.ne.s32.totalorder %s252_s29, %s321_s30  ;;  %p326_p6 = scmp.lt.s32.totalorder %s252_s29, %s252_s29 }
  0x15   :  { %p327_p7 = scmp.lt.s32.totalorder %s325_s5, %s321_s30 }
  0x17   :  { %273 = vmatmul.mubr.msk.bf16.vlgmr.msra.gmra.mxu0 %vm81_vm1, %v288_v3  ;;  %v126_v14 = vld [vmem:[#allocation2] sm:$0xff]  ;;  %v127_v17 = vld [vmem:[#allocation2 + $0x8] sm:$0xff]  ;;  %p328_p8 = por %p327_p7, %p326_p6 }
  0x18   :  { %v140_v43 = vld [vmem:[#allocation3] sm:$0xff]  ;;  %v141_v47 = vld [vmem:[#allocation3 + $0x8] sm:$0xff] }
  0x19   :  { %v176_v36 = vld [vmem:[#allocation4] sm:$0xff]  ;;  %v177_v52 = vld [vmem:[#allocation4 + $0x8] sm:$0xff]  ;;  %p329_p9 = pnand %p328_p8, %p322_p5 }
  0xd7   :  { %v119_v7 = vpop.f32.mrf.mxu0 }
  0xd8   :  { %v120_v8 = vadd.f32 %v260_v6, %v119_v7 }
  0xd9   :  { %v274_v9 = vpop.f32.mrf.mxu0 }
  0xda   :  { %128 = vmax.xlane.f32.xlu0 %v120_v8 }
  0xdb   :  { %v122_v10 = vpop.f32.mrf.mxu0 }
  0xdc   :  { %v123_v11 = vadd.f32 %v260_v6, %v122_v10 }
  0xdd   :  { %v275_v12 = vpop.f32.mrf.mxu0 }
  0xde   :  { %130 = vmax.xlane.f32.xlu0 %v123_v11 }
  0xf4   :  { %181 = vperm.xlu0 %285, %v178_v13   ;;  %v226_v13 = vld [vmem:[#allocation8] sm:$0x1] }
 0x163   :  { %v129_v15 = vpop.xlane.xlu0 %128 }
 0x164   :  { %v132_v16 = vmax.f32 %v126_v14, %v129_v15 }
 0x166   :  { %v134_v18 = vsub.f32 %v126_v14, %v132_v16  ;;  %169 = vst.msk [vmem:[#allocation2] sm:$0xff] %vm44_vm2, %v132_v16  ;;  %146 = vperm.xlu1 %284, %v132_v16  }
 0x167   :  { %v131_v19 = vpop.xlane.xlu0 %130 }
 0x168   :  { %v133_v20 = vmax.f32 %v127_v17, %v131_v19  ;;  %v136_v40 = vmul.f32 1.442695, %v134_v18 }
 0x16a   :  { %v135_v22 = vsub.f32 %v127_v17, %v133_v20  ;;  %170 = vst.msk [vmem:[#allocation2 + $0x8] sm:$0xff] %vm44_vm2, %v133_v20  ;;  %151 = vperm.xlu1 %284, %v133_v20  }
 0x16c   :  { %v138_v41 = vmul.f32 1.442695, %v135_v22 }
 0x16d   :  { %v201_v59 = vld [vmem:[#allocation2] sm:$0xff] }
 0x16e   :  { %184 = vperm.xlu1 %284, %v179_v23  }
 0x16f   :  { %v182_v25 = vpop.permute.xlu0 %181 }
 0x170   :  { %vm186_vm3 = vcmp.eq.s32.totalorder %v172_v24, %v182_v25 }
 0x171   :  { %v188_v26 = vsel %vm186_vm3, %v120_v8, 0.0  ;;  %v202_v63 = vld [vmem:[#allocation2 + $0x8] sm:$0xff] }
 0x172   :  { %190 = vadd.xlane.f32.xlu0 %v188_v26 }
 0x1e1   :  { %v147_v27 = vpop.permute.xlu1 %146 }
 0x1e2   :  { %v154_v28 = vsub.f32 %v120_v8, %v147_v27 }
 0x1e4   :  { %v156_v29 = vmul.f32 1.442695, %v154_v28 }
 0x1e5   :  { %v152_v30 = vpop.permute.xlu1 %151 }
 0x1e6   :  { %289 = vpow2.f32 %v156_v29  ;;  %v155_v31 = vsub.f32 %v123_v11, %v152_v30 }
 0x1e8   :  { %v158_v32 = vmul.f32 1.442695, %v155_v31 }
 0x1e9   :  { %v185_v34 = vpop.permute.xlu1 %184 }
 0x1ea   :  { %291 = vpow2.f32 %v158_v32  ;;  %vm187_vm4 = vcmp.eq.s32.totalorder %v172_v24, %v185_v34 }
 0x1eb   :  { %v189_v38 = vsel %vm187_vm4, %v123_v11, 0.0  ;;  %293 = vpow2.f32 %v136_v40 }
 0x1ec   :  { %295 = vpow2.f32 %v138_v41 }
 0x1f3   :  { %v290_v33 = vpop.eup %289 }
 0x1f4   :  { %160 = vadd.xlane.f32.xlu1 %v290_v33 }
 0x1f7   :  { %v292_v35 = vpop.eup %291 }
 0x1f8   :  { %162 = vadd.xlane.f32.xlu1 %v292_v35  ;;  %v294_v42 = vpop.eup %293 }
 0x1f9   :  { %v142_v44 = vmul.f32 %v294_v42, %v140_v43  ;;  %v296_v45 = vpop.eup %295 }
 0x1fa   :  { %v143_v49 = vmul.f32 %v296_v45, %v141_v47 }
 0x1fb   :  { %v191_v37 = vpop.xlane.xlu0 %190 }
 0x1fc   :  { %v194_v39 = vadd.f32 %v191_v37, %v176_v36  ;;  %192 = vadd.xlane.f32.xlu1 %v189_v38 }
 0x1fe   :  { %196 = vst.msk [vmem:[#allocation4] sm:$0xff] %vm44_vm2, %v194_v39 }
 0x205   :  { %v211_v0 = vld [vmem:[#allocation4] sm:$0xff] }
 0x27d   :  { %v161_v46 = vpop.xlane.xlu1 %160 }
 0x27e   :  { %v164_v48 = vadd.f32 %v161_v46, %v142_v44 }
 0x280   :  { %167 = vst.msk [vmem:[#allocation3] sm:$0xff] %vm44_vm2, %v164_v48 }
 0x281   :  { %v163_v50 = vpop.xlane.xlu1 %162 }
 0x282   :  { %v165_v51 = vadd.f32 %v163_v50, %v143_v49 }
 0x284   :  { %168 = vst.msk [vmem:[#allocation3 + $0x8] sm:$0xff] %vm44_vm2, %v165_v51 }
 0x285   :  { %v193_v53 = vpop.xlane.xlu1 %192 }
 0x286   :  { %v195_v54 = vadd.f32 %v193_v53, %v177_v52 }
 0x287   :  { %v203_v55 = vld [vmem:[#allocation3] sm:$0xff] }
 0x288   :  { %197 = vst.msk [vmem:[#allocation4 + $0x8] sm:$0xff] %vm44_vm2, %v195_v54  ;;  %297 = vlog2.f32 %v203_v55 }
 0x28b   :  { %v204_v56 = vld [vmem:[#allocation3 + $0x8] sm:$0xff] }
 0x28c   :  { %299 = vlog2.f32 %v204_v56 }
 0x28f   :  { %v212_v3 = vld [vmem:[#allocation4 + $0x8] sm:$0xff] }
 0x295   :  { %v298_v57 = vpop.eup %297 }
 0x296   :  { %v206_v58 = vmul.f32 0.6931472, %v298_v57 }
 0x298   :  { %v209_v60 = vadd.f32 %v206_v58, %v201_v59 }
 0x299   :  { %v300_v61 = vpop.eup %299 }
 0x29a   :  { %v208_v62 = vmul.f32 0.6931472, %v300_v61  ;;  %v213_v2 = vsub.f32 %v209_v60, %v211_v0 }
 0x29c   :  { %v210_v1 = vadd.f32 %v208_v62, %v202_v63  ;;  %v227_v5 = vsel %vm44_vm2, %v213_v2, 0.0 }
 0x29e   :  { %v214_v4 = vsub.f32 %v210_v1, %v212_v3 }
 0x2a0   :  { %v228_v6 = vsel %vm44_vm2, %v214_v4, 0.0 }
 0x2a1   :  { %v229_v7 = vadd.f32 %v228_v6, %v227_v5 }
 0x2a3   :  { %v230_v8 = vrot.slane %v229_v7, 4 }
 0x2a5   :  { %v231_v9 = vadd.f32 %v230_v8, %v229_v7 }
 0x2a7   :  { %v232_v10 = vrot.slane %v231_v9, 2 }
 0x2a9   :  { %v233_v11 = vadd.f32 %v232_v10, %v231_v9 }
 0x2ab   :  { %v234_v12 = vrot.slane %v233_v11, 1 }
 0x2ad   :  { %v235_v14 = vadd.f32 %v234_v12, %v233_v11 }
 0x2af   :  { %v236_v15 = vadd.f32 %v235_v14, %v226_v13 }
 0x2b1   :  { %238 = vst.msk [vmem:[#allocation8] sm:$0x1] %vm39_vm5, %v236_v15 }
 0x2b8   :  { %v241_v16 = vld [vmem:[#allocation8] sm:$0x1] }
 0x2b9   :  { %v242_v17 = vmul.f32 0.0625, %v241_v16 }
 0x2bb   :  { %244 = vst.msk [vmem:[#allocation8] sm:$0x1] %vm39_vm5, %v242_v17 }
 0x2bc   :  { %332 = shalt.err (!%p329_p9)
}
 0x2bd   :  { %254 = dma.vmem_to_hbm [thread:$0]  %s252_s29, 16, %s428_s4, [#allocation7]  }
 0x2be   :  { %343 = dma.done.wait [#allocation7], 16  }
 0x2bf   :  { %344 = vsyncadd [#allocation7], 4294967280 }
 0x2c0   :  { %258 = vsyncpa [#allocation6], 1 }
 0x2c1   :  { %259 = vsyncpa [#allocation7], 1 }

</bundles_post_ra>
